<compile_context>
chip_gen: v7x
topology: tpu7x:2x2x1
jax: 0.10.0
libtpu: 0.0.40
codegen_flags: <defaults>
</compile_context>

<pallas_src>
import jax
import jax.numpy as jnp
from jax.experimental import pallas as pl
from jax.experimental.pallas import tpu as pltpu


def _vmem_capacity_bytes():
    try:
        return int(pltpu.get_tpu_info().vmem_capacity_bytes)
    except Exception:
        return 64 * 1024 * 1024  # conservative (v7x per-TC) fallback


def _choose_row_tile(n, c, itemsizes, vmem_cap):
    # Sublane packing multiple for the narrowest input dtype: f32->8, bf16->16, int8->32.
    sub = max(8, max(32 // isz for isz in itemsizes))
    # Target ~25% of VMEM for the two double-buffered input streams.
    budget = vmem_cap // 4
    bytes_per_row = max(1, c * sum(itemsizes))
    tn = budget // (2 * bytes_per_row)
    tn = max(sub, min(2048, (tn // sub) * sub))
    # Guarantee >= 2 tiles when the batch allows it, so both v7x TCs get work.
    if n > sub:
        half = ((-(-n // 2) + sub - 1) // sub) * sub
        tn = min(tn, half)
    if tn >= n:
        tn = n  # whole batch in one block; full-dim blocks are layout-exempt
    return tn


def _make_kernel(n, tn):
    needs_mask = (n % tn) != 0

    def kernel(w_ref, yhat_ref, y_ref, out_ref):
        x = yhat_ref[...].astype(jnp.float32)   # (TN, C) logits
        t = y_ref[...].astype(jnp.float32)      # (TN, C) multi-hot targets
        w = w_ref[...].astype(jnp.float32)      # (1, C) -> broadcasts over rows

        # t*log(sigmoid(x)) + (1-t)*log(1-sigmoid(x)) == t*x - softplus(x)
        # softplus(x) = max(x, 0) + log1p(exp(-|x|))  (stable, 2 transcendentals/elem)
        softplus = jnp.maximum(x, 0.0) + jnp.log1p(jnp.exp(-jnp.abs(x)))
        per_elem = w * (t * x - softplus)        # MultiLabelSoftMarginLoss weight
                                                 # semantics: w scales BOTH terms.

        if needs_mask:
            # Last tile overruns N; out-of-bounds rows hold unspecified data.
            i = pl.program_id(0)
            row = jax.lax.broadcasted_iota(jnp.int32, (tn, 1), 0)
            valid = row < (n - i * tn)
            per_elem = jnp.where(valid, per_elem, 0.0)

        # Single fused 2-D reduction per tile; -1/(N*C) scale applied once outside.
        out_ref[...] = jnp.broadcast_to(jnp.sum(per_elem), out_ref.shape)

    return kernel


def bce_calculation(yhat, y, pos_weight):
    """Pallas TPU MultiLabelSoftMarginLoss(weight=pos_weight, reduction='none')
    followed by sum(loss) / len(y).  Returns a scalar float32."""
    n, c = yhat.shape
    itemsizes = (jnp.dtype(yhat.dtype).itemsize, jnp.dtype(y.dtype).itemsize)
    vmem_cap = _vmem_capacity_bytes()
    tn = _choose_row_tile(n, c, itemsizes, vmem_cap)
    num_tiles = pl.cdiv(n, tn)

    # Weight row is tiny (C elems); keeping it f32 and resident costs nothing.
    w2d = pos_weight.reshape(1, c).astype(jnp.float32)

    partials = pl.pallas_call(
        _make_kernel(n, tn),
        out_shape=jax.ShapeDtypeStruct((num_tiles, 1, 128), jnp.float32),
        grid=(num_tiles,),
        in_specs=[
            pl.BlockSpec((1, c), lambda i: (0, 0)),    # weight row: resident
            pl.BlockSpec((tn, c), lambda i: (i, 0)),   # logits tile i (true C, no pad)
            pl.BlockSpec((tn, c), lambda i: (i, 0)),   # targets tile i (true C, no pad)
        ],
        out_specs=pl.BlockSpec((1, 1, 128), lambda i: (i, 0, 0)),  # per-tile partial
        compiler_params=pltpu.CompilerParams(
            dimension_semantics=("parallel",),          # independent tiles -> both TCs
            vmem_limit_bytes=int(vmem_cap * 3 // 4),    # generation-aware, with headroom
        ),
    )(w2d, yhat, y)

    # Tiny final reduction + single combined normalization (original N and C).
    total = jnp.sum(partials[:, 0, 0])
    return -total / jnp.float32(n * c)


def _reference(yhat, y, pos_weight):
    x = yhat.astype(jnp.float32)
    t = y.astype(jnp.float32)
    w = pos_weight.astype(jnp.float32)
    log_sig_pos = jax.nn.log_sigmoid(x)
    log_sig_neg = jax.nn.log_sigmoid(-x)
    per_elem = w[None, :] * (t * log_sig_pos + (1.0 - t) * log_sig_neg)
    per_sample = -jnp.sum(per_elem, axis=-1) / x.shape[1]
    return jnp.sum(per_sample) / x.shape[0]


if __name__ == "__main__":
    key = jax.random.PRNGKey(0)

    # Case 1: small aligned demo shape.
    N, C = 8, 32
    k1, k2 = jax.random.split(key)
    yhat = jax.random.normal(k1, (N, C), dtype=jnp.float32)           # logits
    y = (jax.random.uniform(k2, (N, C)) > 0.5).astype(jnp.float32)    # multi-hot targets
    pos_weight = jnp.linspace(0.5, 1.5, C, dtype=jnp.float32)

    loss = jax.block_until_ready(bce_calculation(yhat, y, pos_weight))
    ref = _reference(yhat, y, pos_weight)
    assert jnp.allclose(loss, ref, rtol=1e-5, atol=1e-5), (loss, ref)

    # Case 2: ragged shapes (N not multiple of 8, C not multiple of 128) ->
    # exercises the full-C lane-exempt blocks and the in-kernel row mask.
    N2, C2 = 10, 33
    k3, k4 = jax.random.split(k1)
    yhat2 = jax.random.normal(k3, (N2, C2), dtype=jnp.float32)
    y2 = (jax.random.uniform(k4, (N2, C2)) > 0.5).astype(jnp.float32)
    pos_weight2 = jnp.linspace(0.25, 2.0, C2, dtype=jnp.float32)

    loss2 = jax.block_until_ready(bce_calculation(yhat2, y2, pos_weight2))
    ref2 = _reference(yhat2, y2, pos_weight2)
    assert jnp.allclose(loss2, ref2, rtol=1e-5, atol=1e-5), (loss2, ref2)

    # Case 3: bf16 logits passthrough (no wrapper-side upcast) + partial last tile.
    N3, C3 = 40, 33
    k5, k6 = jax.random.split(k3)
    yhat3 = jax.random.normal(k5, (N3, C3), dtype=jnp.float32).astype(jnp.bfloat16)
    y3 = (jax.random.uniform(k6, (N3, C3)) > 0.5).astype(jnp.float32)
    pos_weight3 = jnp.linspace(0.5, 2.0, C3, dtype=jnp.float32)

    loss3 = jax.block_until_ready(bce_calculation(yhat3, y3, pos_weight3))
    ref3 = _reference(yhat3, y3, pos_weight3)
    assert jnp.allclose(loss3, ref3, rtol=1e-4, atol=1e-4), (loss3, ref3)

    print("KERNEL_OK")
</pallas_src>

<mosaic_0001>
module attributes {stable_mosaic.version = 11 : i64} {
  func.func @kernel(%arg0: i32, %arg1: memref<1x32xf32, #tpu.memory_space<vmem>>, %arg2: memref<8x32xf32, #tpu.memory_space<vmem>>, %arg3: memref<8x32xf32, #tpu.memory_space<vmem>>, %arg4: memref<1x1x128xf32, #tpu.memory_space<vmem>>) attributes {dimension_semantics = [#tpu.dimension_semantics<parallel>], iteration_bounds = array<i64: 1>, scalar_prefetch = 0 : i64, scratch_operands = 0 : i64, tpu.core_type = #tpu.core_type<tc>, window_params = [{pipeline_mode = #tpu.pipeline_mode<synchronous>, transform_indices = @transform_0, window_bounds = array<i64: 1, 32>}, {transform_indices = @transform_1, window_bounds = array<i64: 8, 32>}, {transform_indices = @transform_2, window_bounds = array<i64: 8, 32>}, {transform_indices = @transform_3, window_bounds = array<i64: 1, 1, 128>}]} {
    %c0 = arith.constant 0 : index
    %c0_0 = arith.constant 0 : index
    %0 = vector.load %arg2[%c0, %c0_0] : memref<8x32xf32, #tpu.memory_space<vmem>>, vector<8x32xf32>
    %c0_1 = arith.constant 0 : index
    %c0_2 = arith.constant 0 : index
    %1 = vector.load %arg3[%c0_1, %c0_2] : memref<8x32xf32, #tpu.memory_space<vmem>>, vector<8x32xf32>
    %c0_3 = arith.constant 0 : index
    %c0_4 = arith.constant 0 : index
    %2 = vector.load %arg1[%c0_3, %c0_4] : memref<1x32xf32, #tpu.memory_space<vmem>>, vector<1x32xf32>
    %cst = arith.constant 0.000000e+00 : f32
    %3 = vector.broadcast %cst : f32 to vector<8x32xf32>
    %4 = arith.maximumf %0, %3 : vector<8x32xf32>
    %5 = math.absf %0 : vector<8x32xf32>
    %cst_5 = arith.constant 0.000000e+00 : f32
    %6 = vector.broadcast %cst_5 : f32 to vector<8x32xf32>
    %7 = arith.subf %6, %5 : vector<8x32xf32>
    %8 = math.exp %7 : vector<8x32xf32>
    %9 = math.log1p %8 : vector<8x32xf32>
    %10 = arith.addf %4, %9 : vector<8x32xf32>
    %11 = arith.mulf %1, %0 : vector<8x32xf32>
    %12 = arith.subf %11, %10 : vector<8x32xf32>
    %13 = vector.broadcast %2 : vector<1x32xf32> to vector<8x32xf32>
    %14 = arith.mulf %13, %12 : vector<8x32xf32>
    %15 = vector.shape_cast %14 : vector<8x32xf32> to vector<1x8x32xf32>
    %cst_6 = arith.constant dense<0.000000e+00> : vector<1xf32>
    %16 = vector.multi_reduction <add>, %15, %cst_6 [1, 2] : vector<1x8x32xf32> to vector<1xf32>
    %17 = vector.shape_cast %16 : vector<1xf32> to vector<1x1x1xf32>
    %18 = vector.extract %17[0, 0, 0] : f32 from vector<1x1x1xf32>
    %19 = vector.broadcast %18 : f32 to vector<1x1x128xf32>
    %c0_7 = arith.constant 0 : index
    %c0_8 = arith.constant 0 : index
    %c0_9 = arith.constant 0 : index
    %20 = vector.load %arg4[%c0_7, %c0_8, %c0_9] : memref<1x1x128xf32, #tpu.memory_space<vmem>>, vector<1x1x128xf32>
    tpu.vector_store %arg4[%c0_7, %c0_8, %c0_9], %19 {strides = array<i32>} : memref<1x1x128xf32, #tpu.memory_space<vmem>>, vector<1x1x128xf32>,
    return
  }
  func.func @transform_0(%arg0: i32) -> (i32, i32) {
    %c0_i32 = arith.constant 0 : i32
    %c0_i32_0 = arith.constant 0 : i32
    %c0_i32_1 = arith.constant 0 : i32
    return %c0_i32, %c0_i32_0 : i32, i32
  }
  func.func @transform_1(%arg0: i32) -> (i32, i32) {
    %c0_i32 = arith.constant 0 : i32
    %c0_i32_0 = arith.constant 0 : i32
    return %arg0, %c0_i32 : i32, i32
  }
  func.func @transform_2(%arg0: i32) -> (i32, i32) {
    %c0_i32 = arith.constant 0 : i32
    %c0_i32_0 = arith.constant 0 : i32
    return %arg0, %c0_i32 : i32, i32
  }
  func.func @transform_3(%arg0: i32) -> (i32, i32, i32) {
    %c0_i32 = arith.constant 0 : i32
    %c0_i32_0 = arith.constant 0 : i32
    %c0_i32_1 = arith.constant 0 : i32
    return %arg0, %c0_i32, %c0_i32_0 : i32, i32, i32
  }
}

</mosaic_0001>

<bundles_post_ra>
// kernel: tpu_custom_call.1
= control target key start
LH: loop header
LB: loop body
LE: loop exit
PB: predicated region body
PF: predicated region fallthrough
CT: control target
= control target key end

     0   :  { %8 = vsyncpa [#allocation3], 0  ;;  %s283_s0 = inlined_call_operand.hbm [shape: f32[1,32], index: 0, kind: input, shape index: {}]   ;;  %s284_s1 = inlined_call_operand.hbm [shape: f32[8,32], index: 1, kind: input, shape index: {}]   ;;  %s285_s2 = inlined_call_operand.hbm [shape: f32[8,32], index: 2, kind: input, shape index: {}]   ;;  %s286_s3 = inlined_call_operand.hbm [shape: f32[1,1,128], index: 3, kind: output, shape index: {}]  }
   0x1   :  { %9 = vsyncpa [#allocation6], 0 }
   0x2   :  { %10 = vsyncpa [#allocation4], 0  ;;  %s211_s12 = smov [#allocation5]   ;;  %s212_s14 = smov [#allocation2]  }
   0x3   :  { %s27_s13 = sshll.u32 %s211_s12, 4  ;;  %s17_s15 = sshll.u32 %s212_s14, 4  ;;  %s28_s13 = int_to_ptr.vmem [resolvable:$true] %s27_s13  ;;  %s18_s15 = int_to_ptr.vmem [resolvable:$true] %s17_s15 }
   0x4   :  { %s117_s18 = scalar_lea.hbm %s284_s1, 128 }
   0x5   :  { %p118_p0 = scmp.ne.s32.totalorder %s284_s1, %s117_s18  ;;  %p121_p1 = scmp.lt.u32.totalorder %s117_s18, %s284_s1 }
   0x7   :  { %p123_p2 = pnand %p121_p1, %p118_p0 }
   0x9   :  { %126 = shalt.err (!%p123_p2)
}
   0xa   :  { %s127_s23 = scalar_lea.vmem %s28_s13, 128  ;;  %p132_p4 = scmp.lt.s32.totalorder %s28_s13, %s28_s13 }
   0xb   :  { %p128_p3 = scmp.ne.s32.totalorder %s28_s13, %s127_s23  ;;  %p133_p5 = scmp.lt.s32.totalorder %s127_s23, %s127_s23 }
   0xd   :  { %p134_p6 = por %p133_p5, %p132_p4 }
   0xf   :  { %p135_p7 = pnand %p134_p6, %p128_p3 }
  0x11   :  { %138 = shalt.err (!%p135_p7)
}
  0x12   :  { %30 = dma.hbm_to_vmem [thread:$0]  %s284_s1, 128, %s28_s13, [#allocation6]  }
  0x13   :  { %s139_s28 = scalar_lea.hbm %s283_s0, 16 }
  0x14   :  { %p140_p8 = scmp.ne.s32.totalorder %s283_s0, %s139_s28  ;;  %p143_p9 = scmp.lt.u32.totalorder %s139_s28, %s283_s0 }
  0x16   :  { %p145_p10 = pnand %p143_p9, %p140_p8 }
  0x18   :  { %148 = shalt.err (!%p145_p10)
}
  0x19   :  { %s149_s6 = scalar_lea.vmem %s18_s15, 16  ;;  %s153_s7 = scalar_lea.vmem %s18_s15, 32 }
  0x1a   :  { %p150_p11 = scmp.ne.s32.totalorder %s18_s15, %s149_s6  ;;  %p154_p12 = scmp.lt.s32.totalorder %s18_s15, %s18_s15 }
  0x1b   :  { %p155_p13 = scmp.lt.s32.totalorder %s153_s7, %s149_s6 }
  0x1d   :  { %p156_p0 = por %p155_p13, %p154_p12 }
  0x1f   :  { %p157_p1 = pnand %p156_p0, %p150_p11 }
  0x21   :  { %160 = shalt.err (!%p157_p1)
}
  0x22   :  { %20 = dma.hbm_to_vmem [thread:$0]  %s283_s0, 16, %s18_s15, [#allocation3]  }
  0x23   :  { %s213_s9 = smov [#allocation7]   ;;  %s161_s13 = scalar_lea.hbm %s285_s2, 128 }
  0x24   :  { %s37_s10 = sshll.u32 %s213_s9, 4  ;;  %p162_p2 = scmp.ne.s32.totalorder %s285_s2, %s161_s13  ;;  %s38_s10 = int_to_ptr.vmem [resolvable:$true] %s37_s10 }
  0x25   :  { %p165_p3 = scmp.lt.u32.totalorder %s161_s13, %s285_s2 }
  0x27   :  { %p167_p4 = pnand %p165_p3, %p162_p2 }
  0x29   :  { %170 = shalt.err (!%p167_p4)
}
  0x2a   :  { %s171_s19 = scalar_lea.vmem %s38_s10, 128  ;;  %p176_p6 = scmp.lt.s32.totalorder %s38_s10, %s38_s10 }
  0x2b   :  { %p172_p5 = scmp.ne.s32.totalorder %s38_s10, %s171_s19  ;;  %p177_p7 = scmp.lt.s32.totalorder %s171_s19, %s171_s19 }
  0x2d   :  { %p178_p8 = por %p177_p7, %p176_p6 }
  0x2f   :  { %p179_p9 = pnand %p178_p8, %p172_p5 }
  0x31   :  { %182 = shalt.err (!%p179_p9)
}
  0x32   :  { %40 = dma.hbm_to_vmem [thread:$0]  %s285_s2, 128, %s38_s10, [#allocation6]  }
  0x33   :  { %205 = dma.done.wait [#allocation3], 16  }
  0x34   :  { %206 = vsyncadd [#allocation3], 4294967280 }
  0x35   :  { %207 = dma.done.wait [#allocation6], 256  }
  0x36   :  { %208 = vsyncadd [#allocation6], 4294967040  ;;  %v50_v0 = vld [vmem:[#allocation5] sm:$0xff]  ;;  %v51_v9 = vld [vmem:[#allocation7] sm:$0xff]  ;;  %vm77_vm1 = vcmask 261120   ;;  %s214_s2 = smov [#allocation8]  }
  0x37   :  { %v54_v1 = vand.u32 2147483647, %v50_v0  ;;  %v53_v12 = vmax.f32 %v50_v0, 0.0  ;;  %v68_v14 = vmul.f32 %v51_v9, %v50_v0  ;;  %v106_v17 = vld [vmem:[#allocation2] ss:$0 sm:$0xff]  ;;  %s96_s20 = sshll.u32 %s214_s2, 4  ;;  %s97_s20 = int_to_ptr.vmem [resolvable:$true] %s96_s20 }
  0x38   :  { %s183_s22 = scalar_lea.vmem %s97_s20, 16  ;;  %s187_s23 = scalar_lea.vmem %s97_s20, 32 }
  0x39   :  { %v55_v2 = vsub.f32 0.0, %v54_v1  ;;  %p184_p10 = scmp.ne.s32.totalorder %s97_s20, %s183_s22  ;;  %p188_p11 = scmp.lt.s32.totalorder %s97_s20, %s97_s20 }
  0x3a   :  { %p189_p12 = scmp.lt.s32.totalorder %s187_s23, %s183_s22 }
  0x3b   :  { %v56_v3 = vmul.f32 1.442695, %v55_v2 }
  0x3c   :  { %p190_p13 = por %p189_p12, %p188_p11 }
  0x3d   :  { %113 = vpow2.f32 %v56_v3 }
  0x3e   :  { %p191_p0 = pnand %p190_p13, %p184_p10 }
  0x47   :  { %v114_v4 = vpop.eup %113 }
  0x48   :  { %v58_v5 = vadd.f32 1.0, %v114_v4  ;;  %v61_v6 = vmul.f32 -0.5, %v114_v4  ;;  %v64_v8 = vand.u32 2147483647, %v114_v4 }
  0x4a   :  { %115 = vlog2.f32 %v58_v5  ;;  %v62_v7 = vadd.f32 1.0, %v61_v6  ;;  %vm65_vm0 = vcmp.lt.f32.partialorder %v64_v8, 0.0004427343 }
  0x4c   :  { %v63_v10 = vmul.f32 %v114_v4, %v62_v7 }
  0x54   :  { %v116_v11 = vpop.eup %115 }
  0x55   :  { %v60_v13 = vmul.f32 0.6931472, %v116_v11 }
  0x57   :  { %v66_v15 = vsel %vm65_vm0, %v63_v10, %v60_v13 }
  0x58   :  { %v67_v16 = vadd.f32 %v66_v15, %v53_v12 }
  0x5a   :  { %v69_v18 = vsub.f32 %v68_v14, %v67_v16 }
  0x5c   :  { %v76_v19 = vmul.f32 %v106_v17, %v69_v18 }
  0x5e   :  { %v78_v20 = vsel %vm77_vm1, %v76_v19, 0.0 }
  0x5f   :  { %79 = vadd.xlane.f32.xlu0 %v78_v20 }
  0xec   :  { %v80_v21 = vpop.xlane.xlu0 %79 }
  0xed   :  { %v81_v22 = vrot.slane %v80_v21, 4 }
  0xef   :  { %v82_v23 = vadd.f32 %v81_v22, %v80_v21 }
  0xf1   :  { %v83_v24 = vrot.slane %v82_v23, 2 }
  0xf3   :  { %v84_v25 = vadd.f32 %v83_v24, %v82_v23 }
  0xf5   :  { %v85_v26 = vrot.slane %v84_v25, 1 }
  0xf7   :  { %v86_v27 = vadd.f32 %v85_v26, %v84_v25 }
  0xf9   :  { %107 = vpush %v86_v27 }
 0x12a   :  { %s108_s21 = spop %107 }
 0x12b   :  { %v88_v28 = vstv %s108_s21 }
 0x12c   :  { %89 = vst [vmem:[#allocation8] sm:$0x1] %v88_v28 }
 0x12d   :  { %194 = shalt.err (!%p191_p0)
}
 0x12e   :  { %s195_s26 = scalar_lea.hbm %s286_s3, 16 }
 0x12f   :  { %p196_p1 = scmp.ne.s32.totalorder %s286_s3, %s195_s26  ;;  %p199_p2 = scmp.lt.u32.totalorder %s195_s26, %s286_s3 }
 0x131   :  { %p201_p3 = pnand %p199_p2, %p196_p1 }
 0x133   :  { %204 = shalt.err (!%p201_p3)
}
 0x134   :  { %99 = dma.vmem_to_hbm [thread:$0]  %s97_s20, 16, %s286_s3, [#allocation4]  }
 0x135   :  { %209 = dma.done.wait [#allocation4], 16  }
 0x136   :  { %210 = vsyncadd [#allocation4], 4294967280 }
 0x137   :  { %103 = vsyncpa [#allocation3], 1 }
 0x138   :  { %104 = vsyncpa [#allocation6], 1 }
 0x139   :  { %105 = vsyncpa [#allocation4], 1 }

</bundles_post_ra>
